<compile_context>
chip_gen: v7x
topology: tpu7x:2x2x1
jax: 0.10.0
libtpu: 0.0.40
codegen_flags: <defaults>
</compile_context>

<pallas_src>
import numpy as np
import jax
import jax.numpy as jnp
from jax import lax
from jax.experimental import pallas as pl
from jax.experimental.pallas import tpu as pltpu


# ---------------------------------------------------------------------------
# Helpers
# ---------------------------------------------------------------------------
def _full_spec(shape):
    return pl.BlockSpec(shape, lambda: (0,) * len(shape))


def _round_up(x, m):
    return ((x + m - 1) // m) * m


def _choose_tile(n_padded, prefs):
    # n_padded is always a multiple of 128, so 128 is a valid fallback.
    for t in prefs:
        if t <= n_padded and n_padded % t == 0:
            return t
    return 128


def _vmem_limit_bytes():
    # Per-generation scoped-VMEM limit: ~75% of physical capacity
    # (96 MiB on v5e/v6e, 48 MiB on v7x), leaving headroom for compiler scratch.
    cap = 64 * 1024 * 1024
    try:
        cap = int(pltpu.get_tpu_info().vmem_capacity_bytes)
    except Exception:
        pass
    return int(cap * 3 // 4)


def _sigmoid_tanh(x):
    # sigmoid(x) == 0.5*(tanh(x/2)+1): single EUP push instead of exp+recip.
    return 0.5 * (jnp.tanh(0.5 * x) + 1.0)


# ---------------------------------------------------------------------------
# Shared encoder body (inputs already bf16; returns Z in bf16)
# ---------------------------------------------------------------------------
def _encode(x, adj, w0, wcat, noise_f32, h2):
    # base_gcn: relu(adj @ (X @ W0)) -- bf16 MXU inputs, f32 accumulation,
    # relu result cast straight to bf16 (single live copy of hidden).
    xw = jnp.dot(x, w0, preferred_element_type=jnp.float32)
    hidden = jnp.maximum(
        jnp.dot(adj, xw.astype(jnp.bfloat16), preferred_element_type=jnp.float32),
        0.0,
    ).astype(jnp.bfloat16)

    # gcn_mean + gcn_logstddev fused: adj @ (hidden @ [W_mu | W_ls])
    hcat = jnp.dot(hidden, wcat, preferred_element_type=jnp.float32)
    acat = jnp.dot(adj, hcat.astype(jnp.bfloat16),
                   preferred_element_type=jnp.float32)          # [N, 2*H2] f32

    mean = acat[:, :h2]
    logstd = acat[:, h2:]

    # reparameterization in f32, stored/returned as bf16 (decoder consumes bf16)
    return (noise_f32 * jnp.exp(logstd) + mean).astype(jnp.bfloat16)


# ---------------------------------------------------------------------------
# Kernels
# ---------------------------------------------------------------------------
def _vgae_fused_kernel(x_ref, adj_ref, w0_ref, wcat_ref, noise_ref, out_ref):
    """Small-N path: encoder + decoder in one kernel (whole arrays in VMEM)."""
    h2 = noise_ref.shape[1]
    z = _encode(x_ref[...], adj_ref[...], w0_ref[...], wcat_ref[...],
                noise_ref[...], h2)
    # Contract the last dims of both operands: no explicit transpose of Z.
    logits = lax.dot_general(
        z, z, dimension_numbers=(((1,), (1,)), ((), ())),
        preferred_element_type=jnp.float32)
    out_ref[...] = _sigmoid_tanh(logits).astype(out_ref.dtype)


def _vgae_encoder_kernel(x_ref, adj_ref, w0_ref, wcat_ref, noise_ref, z_ref):
    h2 = noise_ref.shape[1]
    z_ref[...] = _encode(x_ref[...], adj_ref[...], w0_ref[...], wcat_ref[...],
                         noise_ref[...], h2)


def _vgae_decoder_kernel(zr_ref, zc_ref, out_ref):
    # zr_ref: [TM, H2] bf16, zc_ref: [TN, H2] bf16 (no per-tile casts).
    logits = lax.dot_general(
        zr_ref[...], zc_ref[...],
        dimension_numbers=(((1,), (1,)), ((), ())),
        preferred_element_type=jnp.float32)                     # [TM, TN]
    # TODO(synk): for large N, return bf16 logits and fuse the sigmoid into a
    # downstream BCE-with-logits loss instead of materializing A_pred.
    out_ref[...] = _sigmoid_tanh(logits).astype(out_ref.dtype)


# ---------------------------------------------------------------------------
# Forward wrapper
# ---------------------------------------------------------------------------
def vgae_forward(x, adj, w0, w_mu, w_ls, noise, *,
                 fuse_threshold=512, force_two_call=False):
    n, d_in = x.shape
    h1 = w0.shape[1]
    h2 = w_mu.shape[1]

    # Fuse the mean / logstd weights along the output dim -> one matmul pair.
    w_cat = jnp.concatenate([w_mu, w_ls], axis=1)               # [H1, 2*H2]

    # Cast MXU operands to bf16 ONCE at the boundary.
    x_bf = x.astype(jnp.bfloat16)
    adj_bf = adj.astype(jnp.bfloat16)
    w0_bf = w0.astype(jnp.bfloat16)
    wcat_bf = w_cat.astype(jnp.bfloat16)
    noise_f32 = noise.astype(jnp.float32)

    vmem_limit = _vmem_limit_bytes()

    enc_flops = 2 * (n * d_in * h1 + n * n * h1 + n * h1 * 2 * h2 + n * n * 2 * h2)
    enc_bytes = 2 * (n * d_in + n * n + d_in * h1 + h1 * 2 * h2 + n * h2) + 4 * n * h2

    # ---- small-N fused path: one pallas_call, no Z round trip -------------
    if n <= fuse_threshold and not force_two_call:
        fused_cost = pl.CostEstimate(
            flops=int(enc_flops + 2 * n * n * h2),
            transcendentals=int(n * h2 + n * n),
            bytes_accessed=int(enc_bytes - 2 * n * h2 + 2 * n * n),
        )
        return pl.pallas_call(
            _vgae_fused_kernel,
            out_shape=jax.ShapeDtypeStruct((n, n), jnp.bfloat16),
            grid=(),
            in_specs=[
                _full_spec((n, d_in)),       # X
                _full_spec((n, n)),          # adj
                _full_spec((d_in, h1)),      # W0
                _full_spec((h1, 2 * h2)),    # [W_mu | W_ls]
                _full_spec((n, h2)),         # noise
            ],
            out_specs=_full_spec((n, n)),
            compiler_params=pltpu.CompilerParams(
                vmem_limit_bytes=vmem_limit),
            cost_estimate=fused_cost,
        )(x_bf, adj_bf, w0_bf, wcat_bf, noise_f32)

    # ---- two-call path -----------------------------------------------------
    # Encoder: whole arrays resident in VMEM (bf16 inputs halve the footprint).
    # TODO(synk): tile the encoder over adj row/contraction tiles with an
    # accumulator (rows marked "parallel" -> both v7x TensorCores) once N grows
    # past the whole-array VMEM budget (v7x's 64 MiB binds first).
    enc_cost = pl.CostEstimate(
        flops=int(enc_flops),
        transcendentals=int(n * h2),
        bytes_accessed=int(enc_bytes),
    )
    z = pl.pallas_call(
        _vgae_encoder_kernel,
        out_shape=jax.ShapeDtypeStruct((n, h2), jnp.bfloat16),
        grid=(),
        in_specs=[
            _full_spec((n, d_in)),
            _full_spec((n, n)),
            _full_spec((d_in, h1)),
            _full_spec((h1, 2 * h2)),
            _full_spec((n, h2)),
        ],
        out_specs=_full_spec((n, h2)),
        compiler_params=pltpu.CompilerParams(
            vmem_limit_bytes=vmem_limit),
        cost_estimate=enc_cost,
    )(x_bf, adj_bf, w0_bf, wcat_bf, noise_f32)

    # Decoder: sigmoid(Z @ Z.T), tiled over a 128-padded N x N output.
    n_pad = _round_up(n, 128)
    z_p = z if n_pad == n else jnp.pad(z, ((0, n_pad - n), (0, 0)))

    tn = _choose_tile(n_pad, (512, 256, 128))   # lane axis: prefer wide tiles
    tm = _choose_tile(n_pad, (256, 128))        # sublane axis

    dec_cost = pl.CostEstimate(
        flops=int(2 * n_pad * n_pad * h2),
        transcendentals=int(n_pad * n_pad),
        bytes_accessed=int(2 * (2 * n_pad * h2 + n_pad * n_pad)),  # bf16 in/out
    )
    # TODO(synk): on v7x, exploit symmetry of sigmoid(Z Z^T): compute only
    # i <= j tiles and mirror-write the transpose to halve MXU/EUP work.
    a_pred = pl.pallas_call(
        _vgae_decoder_kernel,
        out_shape=jax.ShapeDtypeStruct((n_pad, n_pad), jnp.bfloat16),
        grid=(n_pad // tm, n_pad // tn),
        in_specs=[
            pl.BlockSpec((tm, h2), lambda i, j: (i, 0)),        # Z row tile
            pl.BlockSpec((tn, h2), lambda i, j: (j, 0)),        # Z "col" tile
        ],
        out_specs=pl.BlockSpec((tm, tn), lambda i, j: (i, j)),
        compiler_params=pltpu.CompilerParams(
            dimension_semantics=("parallel", "parallel"),
            vmem_limit_bytes=vmem_limit),
        cost_estimate=dec_cost,
    )(z_p, z_p)

    if n_pad != n:
        a_pred = a_pred[:n, :n]
    return a_pred


# ---------------------------------------------------------------------------
# Reference / init helpers
# ---------------------------------------------------------------------------
def glorot_init(key, input_dim, output_dim):
    # Matches torch glorot_init semantics: uniform(-r, r), r = sqrt(6/(in+out)).
    init_range = np.sqrt(6.0 / (input_dim + output_dim))
    u = jax.random.uniform(key, (input_dim, output_dim), dtype=jnp.float32)
    return u * 2.0 * init_range - init_range


def vgae_reference(x, adj, w0, w_mu, w_ls, noise):
    hidden = jax.nn.relu(adj @ (x @ w0))
    mean = adj @ (hidden @ w_mu)
    logstd = adj @ (hidden @ w_ls)
    z = noise * jnp.exp(logstd) + mean
    return jax.nn.sigmoid(z @ z.T)


if __name__ == "__main__":
    # Module-consistent small shapes: N nodes, input_dim = N (= adj.shape[0]),
    # hidden1_dim = 32, hidden2_dim = 16.
    N, H1, H2 = 32, 32, 16

    key = jax.random.PRNGKey(0)
    k_x, k_adj, k_w0, k_wmu, k_wls, k_noise = jax.random.split(key, 6)

    x = jax.random.normal(k_x, (N, N), dtype=jnp.float32)

    # Symmetric, row-normalized dense adjacency with self loops.
    a = (jax.random.uniform(k_adj, (N, N)) < 0.15).astype(jnp.float32)
    a = jnp.maximum(a, a.T) + jnp.eye(N, dtype=jnp.float32)
    adj = a / jnp.sum(a, axis=1, keepdims=True)

    w0 = glorot_init(k_w0, N, H1)
    w_mu = glorot_init(k_wmu, H1, H2)
    w_ls = glorot_init(k_wls, H1, H2)

    noise = jax.random.normal(k_noise, (N, H2), dtype=jnp.float32)

    a_ref = np.asarray(vgae_reference(x, adj, w0, w_mu, w_ls, noise))

    # Kernel uses bf16 MXU inputs / bf16 output (f32 accumulation); output is
    # sigmoid-bounded in [0,1], so relaxed tolerances are appropriate.

    # 1) fused single-call path (default at this scale)
    a_fused = vgae_forward(x, adj, w0, w_mu, w_ls, noise)
    jax.block_until_ready(a_fused)
    np.testing.assert_allclose(np.asarray(a_fused).astype(np.float32), a_ref,
                               rtol=5e-2, atol=5e-2)

    # 2) two-call path (whole-array encoder + tiled/padded decoder) also
    #    exercised so the large-N code path is compile/correctness checked.
    a_two = vgae_forward(x, adj, w0, w_mu, w_ls, noise, force_two_call=True)
    jax.block_until_ready(a_two)
    np.testing.assert_allclose(np.asarray(a_two).astype(np.float32), a_ref,
                               rtol=5e-2, atol=5e-2)

    print("KERNEL_OK")
</pallas_src>

<mosaic_0001>
module attributes {stable_mosaic.version = 11 : i64} {
  func.func @_vgae_fused_kernel(%arg0: memref<32x32xbf16, #tpu.memory_space<vmem>>, %arg1: memref<32x32xbf16, #tpu.memory_space<vmem>>, %arg2: memref<32x32xbf16, #tpu.memory_space<vmem>>, %arg3: memref<32x32xbf16, #tpu.memory_space<vmem>>, %arg4: memref<32x16xf32, #tpu.memory_space<vmem>>, %arg5: memref<32x32xbf16, #tpu.memory_space<vmem>>) attributes {dimension_semantics = [], scalar_prefetch = 0 : i64, scratch_operands = 0 : i64, tpu.core_type = #tpu.core_type<tc>} {
    %c0 = arith.constant 0 : index
    %c0_0 = arith.constant 0 : index
    %0 = vector.load %arg0[%c0, %c0_0] : memref<32x32xbf16, #tpu.memory_space<vmem>>, vector<32x32xbf16>
    %c0_1 = arith.constant 0 : index
    %c0_2 = arith.constant 0 : index
    %1 = vector.load %arg1[%c0_1, %c0_2] : memref<32x32xbf16, #tpu.memory_space<vmem>>, vector<32x32xbf16>
    %c0_3 = arith.constant 0 : index
    %c0_4 = arith.constant 0 : index
    %2 = vector.load %arg2[%c0_3, %c0_4] : memref<32x32xbf16, #tpu.memory_space<vmem>>, vector<32x32xbf16>
    %c0_5 = arith.constant 0 : index
    %c0_6 = arith.constant 0 : index
    %3 = vector.load %arg3[%c0_5, %c0_6] : memref<32x32xbf16, #tpu.memory_space<vmem>>, vector<32x32xbf16>
    %c0_7 = arith.constant 0 : index
    %c0_8 = arith.constant 0 : index
    %4 = vector.load %arg4[%c0_7, %c0_8] : memref<32x16xf32, #tpu.memory_space<vmem>>, vector<32x16xf32>
    %cst = arith.constant dense<0.000000e+00> : vector<32x32xf32>
    %5 = tpu.matmul %0, %2, %cst {dimension_numbers = #tpu.dot_dimension_numbers<[1], [0], [0], [1], [0, 0, 1, 1], [], []>} : vector<32x32xbf16>, vector<32x32xbf16>, vector<32x32xf32> -> vector<32x32xf32>
    %6 = arith.truncf %5 : vector<32x32xf32> to vector<32x32xbf16>
    %cst_9 = arith.constant dense<0.000000e+00> : vector<32x32xf32>
    %7 = tpu.matmul %1, %6, %cst_9 {dimension_numbers = #tpu.dot_dimension_numbers<[1], [0], [0], [1], [0, 0, 1, 1], [], []>} : vector<32x32xbf16>, vector<32x32xbf16>, vector<32x32xf32> -> vector<32x32xf32>
    %cst_10 = arith.constant 0.000000e+00 : f32
    %8 = vector.broadcast %cst_10 : f32 to vector<32x32xf32>
    %9 = arith.maximumf %7, %8 : vector<32x32xf32>
    %10 = arith.truncf %9 : vector<32x32xf32> to vector<32x32xbf16>
    %cst_11 = arith.constant dense<0.000000e+00> : vector<32x32xf32>
    %11 = tpu.matmul %10, %3, %cst_11 {dimension_numbers = #tpu.dot_dimension_numbers<[1], [0], [0], [1], [0, 0, 1, 1], [], []>} : vector<32x32xbf16>, vector<32x32xbf16>, vector<32x32xf32> -> vector<32x32xf32>
    %12 = arith.truncf %11 : vector<32x32xf32> to vector<32x32xbf16>
    %cst_12 = arith.constant dense<0.000000e+00> : vector<32x32xf32>
    %13 = tpu.matmul %1, %12, %cst_12 {dimension_numbers = #tpu.dot_dimension_numbers<[1], [0], [0], [1], [0, 0, 1, 1], [], []>} : vector<32x32xbf16>, vector<32x32xbf16>, vector<32x32xf32> -> vector<32x32xf32>
    %14 = vector.extract_strided_slice %13 {offsets = [0, 0], sizes = [32, 16], strides = [1, 1]} : vector<32x32xf32> to vector<32x16xf32>
    %15 = vector.extract_strided_slice %13 {offsets = [0, 16], sizes = [32, 16], strides = [1, 1]} : vector<32x32xf32> to vector<32x16xf32>
    %16 = math.exp %15 : vector<32x16xf32>
    %17 = arith.mulf %4, %16 : vector<32x16xf32>
    %18 = arith.addf %17, %14 : vector<32x16xf32>
    %19 = arith.truncf %18 : vector<32x16xf32> to vector<32x16xbf16>
    %cst_13 = arith.constant dense<0.000000e+00> : vector<32x32xf32>
    %20 = tpu.matmul %19, %19, %cst_13 {dimension_numbers = #tpu.dot_dimension_numbers<[1], [1], [0], [0], [0, 0, 1, 0], [], []>} : vector<32x16xbf16>, vector<32x16xbf16>, vector<32x32xf32> -> vector<32x32xf32>
    %cst_14 = arith.constant 5.000000e-01 : f32
    %21 = vector.broadcast %cst_14 : f32 to vector<32x32xf32>
    %22 = arith.mulf %21, %20 : vector<32x32xf32>
    %23 = math.tanh %22 : vector<32x32xf32>
    %cst_15 = arith.constant 1.000000e+00 : f32
    %24 = vector.broadcast %cst_15 : f32 to vector<32x32xf32>
    %25 = arith.addf %23, %24 : vector<32x32xf32>
    %cst_16 = arith.constant 5.000000e-01 : f32
    %26 = vector.broadcast %cst_16 : f32 to vector<32x32xf32>
    %27 = arith.mulf %26, %25 : vector<32x32xf32>
    %28 = arith.truncf %27 : vector<32x32xf32> to vector<32x32xbf16>
    %c0_17 = arith.constant 0 : index
    %c0_18 = arith.constant 0 : index
    %29 = vector.load %arg5[%c0_17, %c0_18] : memref<32x32xbf16, #tpu.memory_space<vmem>>, vector<32x32xbf16>
    tpu.vector_store %arg5[%c0_17, %c0_18], %28 {strides = array<i32>} : memref<32x32xbf16, #tpu.memory_space<vmem>>, vector<32x32xbf16>,
    return
  }
}

</mosaic_0001>

<bundles_post_ra>
// kernel: tpu_custom_call.1
= control target key start
LH: loop header
LB: loop body
LE: loop exit
PB: predicated region body
PF: predicated region fallthrough
CT: control target
= control target key end

     0   :  { %10 = vsyncpa [#allocation3], 0  ;;  %s737_s0 = inlined_call_operand.vmem [shape: bf16[32,32], index: 0, kind: input, shape index: {}]   ;;  %s738_s1 = inlined_call_operand.vmem [shape: bf16[32,32], index: 1, kind: input, shape index: {}]   ;;  %s739_s2 = inlined_call_operand.vmem [shape: bf16[32,32], index: 2, kind: input, shape index: {}]   ;;  %s740_s3 = inlined_call_operand.hbm [shape: bf16[32,32], index: 3, kind: input, shape index: {}]   ;;  %s741_s4 = inlined_call_operand.vmem [shape: f32[32,16], index: 4, kind: input, shape index: {}]   ;;  %s742_s5 = inlined_call_operand.hbm [shape: bf16[32,32], index: 5, kind: output, shape index: {}]  }
   0x1   :  { %11 = vsyncpa [#allocation4], 0  ;;  %s634_s18 = smov [#allocation2]   ;;  %s586_s22 = scalar_lea.hbm %s740_s3, 256 }
   0x2   :  { %s23_s19 = sshll.u32 %s634_s18, 4  ;;  %p587_p0 = scmp.ne.s32.totalorder %s740_s3, %s586_s22  ;;  %s24_s19 = int_to_ptr.vmem [resolvable:$true] %s23_s19 }
   0x3   :  { %p590_p1 = scmp.lt.u32.totalorder %s586_s22, %s740_s3 }
   0x5   :  { %p592_p2 = pnand %p590_p1, %p587_p0 }
   0x7   :  { %595 = shalt.err (!%p592_p2)
}
   0x8   :  { %s596_s27 = scalar_lea.vmem %s24_s19, 256  ;;  %p601_p4 = scmp.lt.s32.totalorder %s24_s19, %s24_s19 }
   0x9   :  { %p597_p3 = scmp.ne.s32.totalorder %s24_s19, %s596_s27  ;;  %p602_p5 = scmp.lt.s32.totalorder %s596_s27, %s596_s27 }
   0xb   :  { %p603_p6 = por %p602_p5, %p601_p4 }
   0xd   :  { %p604_p7 = pnand %p603_p6, %p597_p3 }
   0xf   :  { %607 = shalt.err (!%p604_p7)
}
  0x10   :  { %s635_s28 = smov 64   ;;  %s636_s29 = smov 4  }
  0x11   :  { %29 = dma.hbm_to_vmem [thread:$0]  %s740_s3, 256, %s24_s19, [#allocation3], %s635_s28, %s635_s28, %s636_s29  }
  0x12   :  { %630 = dma.done.wait [#allocation3], 256  }
  0x13   :  { %631 = vsyncadd [#allocation3], 4294967040  ;;  %v562_v0 = vld [vmem:[%s739_s2] sm:$0xff]   ;;  %v563_v1 = vld [vmem:[%s739_s2 + $0x8] sm:$0xff]   ;;  %vm78_vm0 = vcmask 261120   ;;  %vm359_vm1 = vcmask 130048  }
  0x14   :  { %515 = vmatprep.subr.bf16.mxu1 %v562_v0  ;;  %v564_v2 = vld [vmem:[%s737_s0] sm:$0xff]   ;;  %v565_v3 = vld [vmem:[%s737_s0 + $0x8] sm:$0xff]   ;;  %v54_v42 = vld [vmem:[%s741_s4 + $0x10] sm:$0xff]  ;;  %vm447_vm2 = vcmask 257024  }
  0x15   :  { %516 = vmatpush3.bf16.msra.mxu1 %v562_v0  ;;  %519 = vmatprep.mubr.msk.bf16.mxu1 %vm78_vm0, %v564_v2  ;;  %v566_v4 = vld [vmem:[%s738_s1] sm:$0xff]   ;;  %v567_v11 = vld [vmem:[%s738_s1 + $0x8] sm:$0xff]   ;;  %s637_s1 = smov 112   ;;  %v55_v46 = vld [vmem:[%s741_s4 + $0x18] sm:$0xff] }
  0x16   :  { %517 = vmatprep.subr.bf16.mxu1 %v563_v1  ;;  %v568_v12 = vld [vmem:[#allocation2] sm:$0xff]   ;;  %v569_v13 = vld [vmem:[#allocation2 + $0x8] sm:$0xff]  }
  0x17   :  { %531 = vmatprep.subr.bf16.mxu0 %v568_v12  ;;  %v52_v44 = vld [vmem:[%s741_s4] sm:$0xff]  ;;  %v53_v48 = vld [vmem:[%s741_s4 + $0x8] sm:$0xff]  ;;  %s638_s4 = smov [#allocation5]  }
  0x18   :  { %532 = vmatpush3.bf16.msra.mxu0 %v568_v12  ;;  %s457_s24 = sshll.u32 %s638_s4, 4  ;;  %s458_s24 = int_to_ptr.vmem [resolvable:$true] %s457_s24 }
  0x19   :  { %518 = vmatpush3.bf16.msra.mxu1 %v563_v1  ;;  %533 = vmatprep.subr.bf16.mxu0 %v569_v13  ;;  %s608_s25 = scalar_lea.vmem %s458_s24, 256  ;;  %p613_p9 = scmp.lt.s32.totalorder %s458_s24, %s458_s24 }
  0x1a   :  { %p609_p8 = scmp.ne.s32.totalorder %s458_s24, %s608_s25  ;;  %p614_p10 = scmp.lt.s32.totalorder %s608_s25, %s608_s25 }
  0x1c   :  { %520 = vmatmul.mubr.msk.bf16.vlgmr.msra.gmra.mrb[0].mxu1 %vm78_vm0, %v565_v3  ;;  %534 = vmatpush3.bf16.msra.mxu0 %v569_v13  ;;  %p615_p11 = por %p614_p10, %p613_p9 }
  0x1d   :  { %527 = vmatprep.mubr.msk.bf16.mxu1 %vm78_vm0, %v566_v4 }
  0x1e   :  { %p616_p12 = pnand %p615_p11, %p609_p8 }
  0xef   :  { %v521_v5 = vpop.f32.mrb[0].mxu1 }
  0xf0   :  { %v119_v6 = vpop.f32.mrb[1].mxu1 }
  0xf1   :  { %v522_v7 = vpop.f32.mrb[2].mxu1 }
  0xf2   :  { %v135_v8 = vpack.c.bf16 %v522_v7, %v521_v5  ;;  %v122_v9 = vpop.f32.mrb[3].mxu1 }
  0xf3   :  { %v134_v10 = vpack.c.bf16 %v122_v9, %v119_v6 }
  0xf5   :  { %523 = vmatprep.subr.bf16.mxu1 %v134_v10 }
  0xf6   :  { %524 = vmatpush3.bf16.msra.mxu1 %v134_v10 }
  0xf7   :  { %525 = vmatprep.subr.bf16.mxu1 %v135_v8 }
  0xfa   :  { %526 = vmatpush3.bf16.msra.mxu1 %v135_v8 }
  0xfd   :  { %528 = vmatmul.mubr.msk.bf16.vlgmr.msra.gmra.mrb[4].mxu1 %vm78_vm0, %v567_v11 }
  0xfe   :  { %543 = vmatprep.mubr.msk.bf16.mxu1 %vm78_vm0, %v566_v4 }
 0x1d0   :  { %v529_v14 = vpop.f32.mrb[4].mxu1 }
 0x1d1   :  { %v186_v15 = vpop.f32.mrb[5].mxu1  ;;  %v203_v17 = vmax.f32 %v529_v14, 0.0 }
 0x1d2   :  { %v530_v16 = vpop.f32.mrb[6].mxu1  ;;  %v201_v20 = vmax.f32 %v186_v15, 0.0 }
 0x1d3   :  { %v204_v18 = vmax.f32 %v530_v16, 0.0  ;;  %v189_v19 = vpop.f32.mrb[7].mxu1 }
 0x1d4   :  { %v202_v21 = vmax.f32 %v189_v19, 0.0 }
 0x1d5   :  { %v206_v22 = vpack.c.bf16 %v204_v18, %v203_v17 }
 0x1d6   :  { %v205_v23 = vpack.c.bf16 %v202_v21, %v201_v20 }
 0x1d8   :  { %535 = vmatprep.mubr.msk.bf16.mxu0 %vm78_vm0, %v205_v23 }
 0x1d9   :  { %536 = vmatmul.mubr.msk.bf16.vlgmr.msra.gmra.mrb[0].mxu0 %vm78_vm0, %v206_v22 }
 0x2ac   :  { %v537_v24 = vpop.f32.mrb[0].mxu0 }
 0x2ad   :  { %v259_v25 = vpop.f32.mrb[1].mxu0 }
 0x2ae   :  { %v538_v26 = vpop.f32.mrb[2].mxu0 }
 0x2af   :  { %v275_v27 = vpack.c.bf16 %v538_v26, %v537_v24  ;;  %v262_v28 = vpop.f32.mrb[3].mxu0 }
 0x2b0   :  { %v274_v29 = vpack.c.bf16 %v262_v28, %v259_v25 }
 0x2b2   :  { %539 = vmatprep.subr.bf16.mxu1 %v274_v29 }
 0x2b3   :  { %540 = vmatpush3.bf16.msra.mxu1 %v274_v29 }
 0x2b4   :  { %541 = vmatprep.subr.bf16.mxu1 %v275_v27 }
 0x2b7   :  { %542 = vmatpush3.bf16.msra.mxu1 %v275_v27 }
 0x2ba   :  { %544 = vmatmul.mubr.msk.bf16.vlgmr.msra.gmra.mrb[8].mxu1 %vm78_vm0, %v567_v11 }
 0x38d   :  { %v545_v30 = vpop.f32.mrb[8].mxu1 }
 0x38e   :  { %v329_v31 = vmul.f32 1.442695, %v545_v30  ;;  %v310_v32 = vpop.f32.mrb[9].mxu1 }
 0x38f   :  { %v325_v33 = vmul.f32 1.442695, %v310_v32  ;;  %v546_v34 = vpop.f32.mrb[10].mxu1 }
 0x390   :  { %570 = vpow2.f32 %v329_v31  ;;  %v331_v35 = vmul.f32 1.442695, %v546_v34  ;;  %v313_v36 = vpop.f32.mrb[11].mxu1 }
 0x391   :  { %572 = vpow2.f32 %v325_v33  ;;  %v327_v37 = vmul.f32 1.442695, %v313_v36 }
 0x392   :  { %574 = vpow2.f32 %v331_v35 }
 0x393   :  { %576 = vpow2.f32 %v327_v37 }
 0x39a   :  { %v571_v38 = vpop.eup %570 }
 0x39b   :  { %v573_v39 = vpop.eup %572  ;;  %341 = vrot.lane.b32.xlu1 %v571_v38, %s637_s1 }
 0x39c   :  { %337 = vrot.lane.b32.xlu0 %v573_v39, %s637_s1  ;;  %v575_v40 = vpop.eup %574 }
 0x39d   :  { %v577_v41 = vpop.eup %576 }
 0x39f   :  { %343 = vrot.lane.b32.xlu1 %v575_v40, %s637_s1 }
 0x3a0   :  { %339 = vrot.lane.b32.xlu0 %v577_v41, %s637_s1 }
 0x40d   :  { %v342_v43 = vpop.permute.xlu1 %341 }
 0x40e   :  { %v338_v45 = vpop.permute.xlu0 %337  ;;  %v351_v47 = vmul.f32 %v342_v43, %v54_v42 }
 0x40f   :  { %v349_v49 = vmul.f32 %v338_v45, %v52_v44 }
 0x410   :  { %v355_v54 = vadd.f32 %v545_v30, %v351_v47 }
 0x411   :  { %v344_v50 = vpop.permute.xlu1 %343  ;;  %v353_v56 = vadd.f32 %v349_v49, %v310_v32 }
 0x412   :  { %v352_v51 = vmul.f32 %v344_v50, %v55_v46  ;;  %v340_v52 = vpop.permute.xlu0 %339 }
 0x413   :  { %v350_v53 = vmul.f32 %v340_v52, %v53_v48 }
 0x414   :  { %v356_v55 = vadd.f32 %v546_v34, %v352_v51 }
 0x415   :  { %v354_v57 = vadd.f32 %v350_v53, %v313_v36 }
 0x416   :  { %v358_v58 = vpack.c.bf16 %v356_v55, %v355_v54 }
 0x417   :  { %v357_v59 = vpack.c.bf16 %v354_v57, %v353_v56 }
 0x418   :  { %v364_v61 = vsel %vm359_vm1, %v358_v58, 0 }
 0x419   :  { %555 = vmatprep.subr.msk.bf16.mxu0 %vm359_vm1, %v357_v59  ;;  %551 = vmatprep.mubr.msk.bf16.mxu0 %vm359_vm1, %v357_v59  ;;  %v361_v60 = vsel %vm359_vm1, %v357_v59, 0 }
 0x41a   :  { %548 = vmatpush3.bf16.xpose.msra.mxu0 %v361_v60 }
 0x41b   :  { %556 = vmatprep.subr.msk.bf16.mxu0 %vm359_vm1, %v358_v58 }
 0x422   :  { %550 = vmatpush3.bf16.xpose.msra.mxu0 %v364_v61 }
 0x429   :  { %552 = vmatmul.mubr.msk.bf16.vlgmr.msra.gmra.mrb[4].mxu0 %vm359_vm1, %v358_v58 }
 0x4fc   :  { %v553_v62 = vpop.f32.mrb[4].mxu0 }
 0x4fd   :  { %v417_v63 = vmul.f32 0.5, %v553_v62  ;;  %v400_v0 = vpop.f32.mrb[5].mxu0 }
 0x4fe   :  { %v415_v1 = vmul.f32 0.5, %v400_v0  ;;  %v554_v2 = vpop.f32.mrb[6].mxu0 }
 0x4ff   :  { %578 = vtanh.f32 %v417_v63  ;;  %v418_v3 = vmul.f32 0.5, %v554_v2  ;;  %v403_v4 = vpop.f32.mrb[7].mxu0 }
 0x500   :  { %580 = vtanh.f32 %v415_v1  ;;  %v416_v5 = vmul.f32 0.5, %v403_v4 }
 0x501   :  { %582 = vtanh.f32 %v418_v3 }
 0x502   :  { %584 = vtanh.f32 %v416_v5 }
 0x509   :  { %v579_v6 = vpop.eup %578 }
 0x50a   :  { %v581_v7 = vpop.eup %580  ;;  %v425_v8 = vadd.f32 1.0, %v579_v6 }
 0x50b   :  { %v583_v9 = vpop.eup %582  ;;  %v423_v10 = vadd.f32 1.0, %v581_v7 }
 0x50c   :  { %v585_v11 = vpop.eup %584  ;;  %v429_v12 = vmul.f32 0.5, %v425_v8  ;;  %v426_v13 = vadd.f32 1.0, %v583_v9 }
 0x50d   :  { %v427_v14 = vmul.f32 0.5, %v423_v10  ;;  %v424_v15 = vadd.f32 1.0, %v585_v11 }
 0x50e   :  { %v493_v16 = vpack.c.bf16 %v429_v12, %v429_v12  ;;  %v430_v17 = vmul.f32 0.5, %v426_v13 }
 0x50f   :  { %v491_v18 = vpack.c.bf16 %v427_v14, %v427_v14  ;;  %v428_v19 = vmul.f32 0.5, %v424_v15 }
 0x510   :  { %v494_v20 = vpack.c.bf16 %v430_v17, %v430_v17  ;;  %450 = vst.msk [vmem:[#allocation5 + $0x8] sm:$0xf] %vm447_vm2, %v493_v16 }
 0x511   :  { %v492_v21 = vpack.c.bf16 %v428_v19, %v428_v19  ;;  %448 = vst.msk [vmem:[#allocation5] sm:$0xf] %vm447_vm2, %v491_v18 }
 0x512   :  { %451 = vst.msk [vmem:[#allocation5 + $0xc] sm:$0xf] %vm447_vm2, %v494_v20 }
 0x513   :  { %449 = vst.msk [vmem:[#allocation5 + $0x4] sm:$0xf] %vm447_vm2, %v492_v21 }
 0x514   :  { %619 = shalt.err (!%p616_p12)
}
 0x515   :  { %s620_s30 = scalar_lea.hbm %s742_s5, 256 }
 0x516   :  { %p621_p13 = scmp.ne.s32.totalorder %s742_s5, %s620_s30  ;;  %p624_p0 = scmp.lt.u32.totalorder %s620_s30, %s742_s5 }
 0x518   :  { %p626_p1 = pnand %p624_p0, %p621_p13 }
 0x51a   :  { %629 = shalt.err (!%p626_p1)
}
 0x51b   :  { %463 = dma.vmem_to_hbm [thread:$0]  %s458_s24, 256, %s742_s5, [#allocation4], %s635_s28, %s635_s28, %s636_s29  }
 0x51c   :  { %632 = dma.done.wait [#allocation4], 256  }
 0x51d   :  { %633 = vsyncadd [#allocation4], 4294967040 }
 0x51e   :  { %467 = vsyncpa [#allocation3], 1 }
 0x51f   :  { %468 = vsyncpa [#allocation4], 1 }

</bundles_post_ra>
